<compile_context>
chip_gen: v5e
topology: v5e:2x2
jax: 0.10.0
libtpu: 0.0.40
codegen_flags: <defaults>
</compile_context>

<pallas_src>
import functools

import jax
import jax.numpy as jnp
from jax.experimental import pallas as pl
from jax.experimental.pallas import tpu as pltpu

K_IN = 28 * 28          # 784, logical contraction dim of fc1
K_PAD = 896             # 7 * 128, lane-dense padded contraction dim
H = 64                  # hidden width
N_OUT = 10              # logits
N_PAD = 128             # lane-dense padded output width
MAX_TM = 1024           # batch tile cap, sized for v7x's 64 MiB VMEM (bf16 x rows)


def _round_up(x, m):
    return ((x + m - 1) // m) * m


def mlp_kernel(x_ref, w1_ref, b1_ref, w2_ref, b2_ref, w3_ref, b3_ref, o_ref):
    x = x_ref[...]                                                   # (TM, 896) bf16
    # fc1 + ReLU  (bf16 MXU, f32 accumulate, f32 elementwise)
    h1 = jnp.dot(x, w1_ref[...], preferred_element_type=jnp.float32)
    h1 = jnp.maximum(h1 + b1_ref[...], 0.0)                          # (TM, 64) f32
    # fc2 + ReLU
    h2 = jnp.dot(h1.astype(jnp.bfloat16), w2_ref[...],
                 preferred_element_type=jnp.float32)
    h2 = jnp.maximum(h2 + b2_ref[...], 0.0)                          # (TM, 64) f32
    # fc3 (logits, lane-padded to 128; no activation)
    o = jnp.dot(h2.astype(jnp.bfloat16), w3_ref[...],
                preferred_element_type=jnp.float32)
    o_ref[...] = o + b3_ref[...]                                     # (TM, 128) f32


@functools.partial(jax.jit, static_argnames=())
def net_forward(x_nchw, params):
    """Equivalent of Net.forward: x.view(-1, 784) -> fc1/relu -> fc2/relu -> fc3."""
    w1, b1, w2, b2, w3, b3 = params     # w1:(896,64) w2:(64,64) w3:(64,128) bf16; b f32
    B = x_nchw.shape[0]

    # Flatten (== x.view(-1, 784)), zero-pad K to 896, cast to bf16.
    x2d = x_nchw.reshape(B, K_IN).astype(jnp.float32)
    x2d = jnp.pad(x2d, ((0, 0), (0, K_PAD - K_IN)))

    # Batch tile: multiple of 16 (bf16 sublane packing), capped for v7x VMEM budget.
    TM = min(MAX_TM, _round_up(B, 16))
    Bp = _round_up(B, TM)
    if Bp != B:
        x2d = jnp.pad(x2d, ((0, Bp - B), (0, 0)))
    xb = x2d.astype(jnp.bfloat16)

    grid = (Bp // TM,)

    # Streamed operands: x tile and output tile follow the grid index.
    x_spec = pl.BlockSpec((TM, K_PAD), lambda i: (i, 0))
    o_spec = pl.BlockSpec((TM, N_PAD), lambda i: (i, 0))
    # Resident operands: full array, constant index map -> stay in VMEM across steps.
    resident = lambda shape: pl.BlockSpec(shape, lambda i: tuple(0 for _ in shape))

    # Derive a VMEM budget from the actual tiles (double-buffered x/out + resident
    # weights + f32 intermediates), with generous slack.
    weight_bytes = (K_PAD * H + H * H + H * N_PAD) * 2 + (H + H + N_PAD) * 4
    tile_bytes = (2 * TM * K_PAD * 2          # x, double buffered, bf16
                  + 2 * TM * N_PAD * 4        # out, double buffered, f32
                  + 2 * TM * H * 4            # h1/h2 intermediates, f32
                  + weight_bytes)
    vmem_limit = min(tile_bytes * 2 + (8 << 20), 64 << 20)

    cost = pl.CostEstimate(
        flops=2 * Bp * (K_PAD * H + H * H + H * N_PAD),
        transcendentals=0,
        bytes_accessed=Bp * K_PAD * 2 + weight_bytes + Bp * N_PAD * 4,
    )

    out = pl.pallas_call(
        mlp_kernel,
        out_shape=jax.ShapeDtypeStruct((Bp, N_PAD), jnp.float32),
        grid=grid,
        in_specs=[
            x_spec,
            resident(w1.shape), resident(b1.shape),
            resident(w2.shape), resident(b2.shape),
            resident(w3.shape), resident(b3.shape),
        ],
        out_specs=o_spec,
        compiler_params=pltpu.CompilerParams(
            dimension_semantics=("parallel",),
            vmem_limit_bytes=vmem_limit,
        ),
        cost_estimate=cost,
    )(xb, w1, b1, w2, b2, w3, b3)

    return out[:B, :N_OUT]


def init_params(key):
    """Deterministic params; mimics nn.Linear's U(-1/sqrt(fan_in), 1/sqrt(fan_in)).

    Weights are stored as (in, out) so the kernel computes y = x @ W + b.
    w1 is zero-padded along K (784 -> 896); w3/b3 are zero-padded along N (10 -> 128).
    Weights are bf16, biases f32.
    """
    def linear(key, fan_in, fan_out):
        kw, kb = jax.random.split(key)
        bound = 1.0 / jnp.sqrt(jnp.float32(fan_in))
        w = jax.random.uniform(kw, (fan_in, fan_out), jnp.float32, -bound, bound)
        b = jax.random.uniform(kb, (1, fan_out), jnp.float32, -bound, bound)
        return w, b

    k1, k2, k3 = jax.random.split(key, 3)
    w1, b1 = linear(k1, K_IN, H)
    w2, b2 = linear(k2, H, H)
    w3, b3 = linear(k3, H, N_OUT)

    # Lane-dense padding (zeros contribute nothing to the matmuls).
    w1 = jnp.pad(w1, ((0, K_PAD - K_IN), (0, 0)))
    w3 = jnp.pad(w3, ((0, 0), (0, N_PAD - N_OUT)))
    b3 = jnp.pad(b3, ((0, 0), (0, N_PAD - N_OUT)))

    return (w1.astype(jnp.bfloat16), b1,
            w2.astype(jnp.bfloat16), b2,
            w3.astype(jnp.bfloat16), b3)


if __name__ == "__main__":
    key = jax.random.PRNGKey(0)
    kx, kp = jax.random.split(key)

    B = 8
    x = jax.random.normal(kx, (B, 1, 28, 28), jnp.float32)   # NCHW, like an MNIST batch
    params = init_params(kp)

    logits = net_forward(x, params)
    jax.block_until_ready(logits)
    assert logits.shape == (B, N_OUT)

    # Reference: same math in plain JAX (bf16 operands, f32 accumulation), using the
    # unpadded slices of the padded parameters.
    w1, b1, w2, b2, w3, b3 = params
    x2d = x.reshape(B, K_IN).astype(jnp.bfloat16)
    ref = jnp.dot(x2d, w1[:K_IN], preferred_element_type=jnp.float32) + b1
    ref = jnp.maximum(ref, 0.0)
    ref = jnp.dot(ref.astype(jnp.bfloat16), w2, preferred_element_type=jnp.float32) + b2
    ref = jnp.maximum(ref, 0.0)
    ref = jnp.dot(ref.astype(jnp.bfloat16), w3, preferred_element_type=jnp.float32) + b3
    ref = ref[:, :N_OUT]

    assert jnp.allclose(logits, ref, atol=1e-2, rtol=1e-2), (
        float(jnp.max(jnp.abs(logits - ref))))

    print("KERNEL_OK")
</pallas_src>

<mosaic_0001>
module attributes {stable_mosaic.version = 11 : i64} {
  func.func @mlp_kernel(%arg0: i32, %arg1: memref<16x896xbf16, #tpu.memory_space<vmem>>, %arg2: memref<896x64xbf16, #tpu.memory_space<vmem>>, %arg3: memref<1x64xf32, #tpu.memory_space<vmem>>, %arg4: memref<64x64xbf16, #tpu.memory_space<vmem>>, %arg5: memref<1x64xf32, #tpu.memory_space<vmem>>, %arg6: memref<64x128xbf16, #tpu.memory_space<vmem>>, %arg7: memref<1x128xf32, #tpu.memory_space<vmem>>, %arg8: memref<16x128xf32, #tpu.memory_space<vmem>>) attributes {dimension_semantics = [#tpu.dimension_semantics<parallel>], iteration_bounds = array<i64: 1>, scalar_prefetch = 0 : i64, scratch_operands = 0 : i64, tpu.core_type = #tpu.core_type<tc>, window_params = [{transform_indices = @transform_0, window_bounds = array<i64: 16, 896>}, {pipeline_mode = #tpu.pipeline_mode<synchronous>, transform_indices = @transform_1, window_bounds = array<i64: 896, 64>}, {pipeline_mode = #tpu.pipeline_mode<synchronous>, transform_indices = @transform_2, window_bounds = array<i64: 1, 64>}, {pipeline_mode = #tpu.pipeline_mode<synchronous>, transform_indices = @transform_3, window_bounds = array<i64: 64, 64>}, {pipeline_mode = #tpu.pipeline_mode<synchronous>, transform_indices = @transform_4, window_bounds = array<i64: 1, 64>}, {pipeline_mode = #tpu.pipeline_mode<synchronous>, transform_indices = @transform_5, window_bounds = array<i64: 64, 128>}, {pipeline_mode = #tpu.pipeline_mode<synchronous>, transform_indices = @transform_6, window_bounds = array<i64: 1, 128>}, {transform_indices = @transform_7, window_bounds = array<i64: 16, 128>}]} {
    %c0 = arith.constant 0 : index
    %c0_0 = arith.constant 0 : index
    %0 = vector.load %arg1[%c0, %c0_0] : memref<16x896xbf16, #tpu.memory_space<vmem>>, vector<16x896xbf16>
    %c0_1 = arith.constant 0 : index
    %c0_2 = arith.constant 0 : index
    %1 = vector.load %arg2[%c0_1, %c0_2] : memref<896x64xbf16, #tpu.memory_space<vmem>>, vector<896x64xbf16>
    %cst = arith.constant dense<0.000000e+00> : vector<16x64xf32>
    %2 = tpu.matmul %0, %1, %cst {dimension_numbers = #tpu.dot_dimension_numbers<[1], [0], [0], [1], [0, 0, 1, 1], [], []>} : vector<16x896xbf16>, vector<896x64xbf16>, vector<16x64xf32> -> vector<16x64xf32>
    %c0_3 = arith.constant 0 : index
    %c0_4 = arith.constant 0 : index
    %3 = vector.load %arg3[%c0_3, %c0_4] : memref<1x64xf32, #tpu.memory_space<vmem>>, vector<1x64xf32>
    %4 = vector.broadcast %3 : vector<1x64xf32> to vector<16x64xf32>
    %5 = arith.addf %2, %4 : vector<16x64xf32>
    %cst_5 = arith.constant 0.000000e+00 : f32
    %6 = vector.broadcast %cst_5 : f32 to vector<16x64xf32>
    %7 = arith.maximumf %5, %6 : vector<16x64xf32>
    %8 = arith.truncf %7 : vector<16x64xf32> to vector<16x64xbf16>
    %c0_6 = arith.constant 0 : index
    %c0_7 = arith.constant 0 : index
    %9 = vector.load %arg4[%c0_6, %c0_7] : memref<64x64xbf16, #tpu.memory_space<vmem>>, vector<64x64xbf16>
    %cst_8 = arith.constant dense<0.000000e+00> : vector<16x64xf32>
    %10 = tpu.matmul %8, %9, %cst_8 {dimension_numbers = #tpu.dot_dimension_numbers<[1], [0], [0], [1], [0, 0, 1, 1], [], []>} : vector<16x64xbf16>, vector<64x64xbf16>, vector<16x64xf32> -> vector<16x64xf32>
    %c0_9 = arith.constant 0 : index
    %c0_10 = arith.constant 0 : index
    %11 = vector.load %arg5[%c0_9, %c0_10] : memref<1x64xf32, #tpu.memory_space<vmem>>, vector<1x64xf32>
    %12 = vector.broadcast %11 : vector<1x64xf32> to vector<16x64xf32>
    %13 = arith.addf %10, %12 : vector<16x64xf32>
    %cst_11 = arith.constant 0.000000e+00 : f32
    %14 = vector.broadcast %cst_11 : f32 to vector<16x64xf32>
    %15 = arith.maximumf %13, %14 : vector<16x64xf32>
    %16 = arith.truncf %15 : vector<16x64xf32> to vector<16x64xbf16>
    %c0_12 = arith.constant 0 : index
    %c0_13 = arith.constant 0 : index
    %17 = vector.load %arg6[%c0_12, %c0_13] : memref<64x128xbf16, #tpu.memory_space<vmem>>, vector<64x128xbf16>
    %cst_14 = arith.constant dense<0.000000e+00> : vector<16x128xf32>
    %18 = tpu.matmul %16, %17, %cst_14 {dimension_numbers = #tpu.dot_dimension_numbers<[1], [0], [0], [1], [0, 0, 1, 1], [], []>} : vector<16x64xbf16>, vector<64x128xbf16>, vector<16x128xf32> -> vector<16x128xf32>
    %c0_15 = arith.constant 0 : index
    %c0_16 = arith.constant 0 : index
    %19 = vector.load %arg7[%c0_15, %c0_16] : memref<1x128xf32, #tpu.memory_space<vmem>>, vector<1x128xf32>
    %20 = vector.broadcast %19 : vector<1x128xf32> to vector<16x128xf32>
    %21 = arith.addf %18, %20 : vector<16x128xf32>
    %c0_17 = arith.constant 0 : index
    %c0_18 = arith.constant 0 : index
    %22 = vector.load %arg8[%c0_17, %c0_18] : memref<16x128xf32, #tpu.memory_space<vmem>>, vector<16x128xf32>
    tpu.vector_store %arg8[%c0_17, %c0_18], %21 {strides = array<i32>} : memref<16x128xf32, #tpu.memory_space<vmem>>, vector<16x128xf32>,
    return
  }
  func.func @transform_0(%arg0: i32) -> (i32, i32) {
    %c0_i32 = arith.constant 0 : i32
    %c0_i32_0 = arith.constant 0 : i32
    return %arg0, %c0_i32 : i32, i32
  }
  func.func @transform_1(%arg0: i32) -> (i32, i32) {
    %c0_i32 = arith.constant 0 : i32
    %c0_i32_0 = arith.constant 0 : i32
    %c0_i32_1 = arith.constant 0 : i32
    return %c0_i32, %c0_i32_0 : i32, i32
  }
  func.func @transform_2(%arg0: i32) -> (i32, i32) {
    %c0_i32 = arith.constant 0 : i32
    %c0_i32_0 = arith.constant 0 : i32
    %c0_i32_1 = arith.constant 0 : i32
    return %c0_i32, %c0_i32_0 : i32, i32
  }
  func.func @transform_3(%arg0: i32) -> (i32, i32) {
    %c0_i32 = arith.constant 0 : i32
    %c0_i32_0 = arith.constant 0 : i32
    %c0_i32_1 = arith.constant 0 : i32
    return %c0_i32, %c0_i32_0 : i32, i32
  }
  func.func @transform_4(%arg0: i32) -> (i32, i32) {
    %c0_i32 = arith.constant 0 : i32
    %c0_i32_0 = arith.constant 0 : i32
    %c0_i32_1 = arith.constant 0 : i32
    return %c0_i32, %c0_i32_0 : i32, i32
  }
  func.func @transform_5(%arg0: i32) -> (i32, i32) {
    %c0_i32 = arith.constant 0 : i32
    %c0_i32_0 = arith.constant 0 : i32
    %c0_i32_1 = arith.constant 0 : i32
    return %c0_i32, %c0_i32_0 : i32, i32
  }
  func.func @transform_6(%arg0: i32) -> (i32, i32) {
    %c0_i32 = arith.constant 0 : i32
    %c0_i32_0 = arith.constant 0 : i32
    %c0_i32_1 = arith.constant 0 : i32
    return %c0_i32, %c0_i32_0 : i32, i32
  }
  func.func @transform_7(%arg0: i32) -> (i32, i32) {
    %c0_i32 = arith.constant 0 : i32
    %c0_i32_0 = arith.constant 0 : i32
    return %arg0, %c0_i32 : i32, i32
  }
}

</mosaic_0001>

<bundles_post_ra>
// kernel: net_forward.1
= control target key start
LH: loop header
LB: loop body
LE: loop exit
PB: predicated region body
PF: predicated region fallthrough
CT: control target
= control target key end

     0   :  { %vm660_vm0 = vcmask 523264   ;;  %s1391_s1 = inlined_call_operand.vmem [shape: bf16[896,64], index: 1, kind: input, shape index: {}]   ;;  %s1392_s2 = inlined_call_operand.vmem [shape: f32[1,64], index: 2, kind: input, shape index: {}]   ;;  %s1393_s0 = inlined_call_operand.vmem [shape: bf16[16,896], index: 0, kind: input, shape index: {}]   ;;  %s1394_s4 = inlined_call_operand.vmem [shape: f32[1,64], index: 4, kind: input, shape index: {}]   ;;  %s1395_s3 = inlined_call_operand.vmem [shape: bf16[64,64], index: 3, kind: input, shape index: {}]   ;;  %s1396_s5 = inlined_call_operand.vmem [shape: bf16[64,128], index: 5, kind: input, shape index: {}]   ;;  %s1397_s6 = inlined_call_operand.vmem [shape: f32[1,128], index: 6, kind: input, shape index: {}]   ;;  %s1398_s7 = inlined_call_operand.vmem [shape: f32[16,128], index: 7, kind: output, shape index: {}]  }
   0x1   :  { %v1040_v0 = vld [vmem:[%s1391_s1 + $0x38] sm:$0xff]  ;;  %v1039_v3 = vld [vmem:[%s1391_s1 + $0x30] sm:$0xff]  ;;  %v1038_v8 = vld [vmem:[%s1391_s1 + $0x28] sm:$0xff] }
   0x2   :  { %v1048_v1 = vld [vmem:[%s1391_s1 + $0x78] sm:$0xff]  ;;  %523 = vmatpush.bf16.msra.mxu0 %v1040_v0  ;;  %v1047_v4 = vld [vmem:[%s1391_s1 + $0x70] sm:$0xff]  ;;  %v1046_v9 = vld [vmem:[%s1391_s1 + $0x68] sm:$0xff] }
   0x3   :  { %v1056_v2 = vld [vmem:[%s1391_s1 + $0xb8] sm:$0xff]  ;;  %537 = vmatpush.bf16.msra.mxu1 %v1048_v1  ;;  %v1055_v6 = vld [vmem:[%s1391_s1 + $0xb0] sm:$0xff]  ;;  %v1054_v10 = vld [vmem:[%s1391_s1 + $0xa8] sm:$0xff] }
   0x4   :  { %v1064_v5 = vld [vmem:[%s1391_s1 + $0xf8] sm:$0xff]  ;;  %551 = vmatpush.bf16.msra.mxu2 %v1056_v2  ;;  %v1063_v7 = vld [vmem:[%s1391_s1 + $0xf0] sm:$0xff]  ;;  %v1062_v11 = vld [vmem:[%s1391_s1 + $0xe8] sm:$0xff] }
   0x5   :  { %565 = vmatpush.bf16.msra.mxu3 %v1064_v5  ;;  %v1037_v12 = vld [vmem:[%s1391_s1 + $0x20] sm:$0xff]  ;;  %v1036_v16 = vld [vmem:[%s1391_s1 + $0x18] sm:$0xff]  ;;  %v1035_v20 = vld [vmem:[%s1391_s1 + $0x10] sm:$0xff] }
   0x6   :  { %524 = vmatpush.bf16.msra.mxu0 %v1039_v3  ;;  %v1045_v13 = vld [vmem:[%s1391_s1 + $0x60] sm:$0xff]  ;;  %v1044_v17 = vld [vmem:[%s1391_s1 + $0x58] sm:$0xff]  ;;  %v1043_v21 = vld [vmem:[%s1391_s1 + $0x50] sm:$0xff] }
   0x7   :  { %538 = vmatpush.bf16.msra.mxu1 %v1047_v4  ;;  %v1053_v14 = vld [vmem:[%s1391_s1 + $0xa0] sm:$0xff]  ;;  %v1052_v18 = vld [vmem:[%s1391_s1 + $0x98] sm:$0xff]  ;;  %v1051_v22 = vld [vmem:[%s1391_s1 + $0x90] sm:$0xff] }
   0x8   :  { %552 = vmatpush.bf16.msra.mxu2 %v1055_v6  ;;  %v1061_v15 = vld [vmem:[%s1391_s1 + $0xe0] sm:$0xff]  ;;  %v1060_v19 = vld [vmem:[%s1391_s1 + $0xd8] sm:$0xff]  ;;  %v1059_v23 = vld [vmem:[%s1391_s1 + $0xd0] sm:$0xff] }
   0x9   :  { %566 = vmatpush.bf16.msra.mxu3 %v1063_v7  ;;  %v1034_v24 = vld [vmem:[%s1391_s1 + $0x8] sm:$0xff]  ;;  %v1033_v27 = vld [vmem:[%s1391_s1] sm:$0xff]  ;;  %v1072_v31 = vld [vmem:[%s1391_s1 + $0x138] sm:$0xff] }
   0xa   :  { %525 = vmatpush.bf16.msra.mxu0 %v1038_v8  ;;  %v1042_v25 = vld [vmem:[%s1391_s1 + $0x48] sm:$0xff]  ;;  %v1041_v29 = vld [vmem:[%s1391_s1 + $0x40] sm:$0xff]  ;;  %v1029_v34 = vld [vmem:[%s1393_s0 + $0x18] sm:$0xf0] }
   0xb   :  { %539 = vmatpush.bf16.msra.mxu1 %v1046_v9  ;;  %v1050_v26 = vld [vmem:[%s1391_s1 + $0x88] sm:$0xff]  ;;  %v1049_v30 = vld [vmem:[%s1391_s1 + $0x80] sm:$0xff]  ;;  %v1080_v38 = vld [vmem:[%s1391_s1 + $0x178] sm:$0xff] }
   0xc   :  { %553 = vmatpush.bf16.msra.mxu2 %v1054_v10  ;;  %v1058_v28 = vld [vmem:[%s1391_s1 + $0xc8] sm:$0xff]  ;;  %v742_v33 = vld [vmem:[%s1393_s0] sm:$0xf]  ;;  %v1030_v35 = vld [vmem:[%s1393_s0 + $0x20] sm:$0xf0] }
   0xd   :  { %567 = vmatpush.bf16.msra.mxu3 %v1062_v11  ;;  %v750_v32 = vld [vmem:[%s1393_s0 + $0x8] sm:$0xf]  ;;  %v1026_v36 = vld [vmem:[%s1393_s0 + $0x4] sm:$0xf]  ;;  %v744_v37 = vld [vmem:[%s1393_s0 + $0x1c] sm:$0xf0]  ;;  %v743_v41 = vor.u32 %v1029_v34, %v742_v33 }
   0xe   :  { %526 = vmatpush.bf16.msra.mxu0 %v1037_v12  ;;  %v1088_v39 = vld [vmem:[%s1391_s1 + $0x1b8] sm:$0xff]  ;;  %v1057_v40 = vld [vmem:[%s1391_s1 + $0xc0] sm:$0xff]  ;;  %v751_v42 = vor.u32 %v1030_v35, %v750_v32  ;;  %v1027_v43 = vld [vmem:[%s1393_s0 + $0xc] sm:$0xf]  ;;  %v747_v45 = vor.u32 %v1026_v36, %v744_v37 }
   0xf   :  { %540 = vmatpush.bf16.msra.mxu1 %v1045_v13  ;;  %v752_v44 = vld [vmem:[%s1393_s0 + $0x24] sm:$0xf0]  ;;  %v1071_v46 = vld [vmem:[%s1391_s1 + $0x130] sm:$0xff]  ;;  %v1069_v53 = vld [vmem:[%s1391_s1 + $0x120] sm:$0xff] }
  0x10   :  { %554 = vmatpush.bf16.msra.mxu2 %v1053_v14  ;;  %v1079_v47 = vld [vmem:[%s1391_s1 + $0x170] sm:$0xff]  ;;  %v755_v49 = vor.u32 %v1027_v43, %v752_v44  ;;  %v1070_v50 = vld [vmem:[%s1391_s1 + $0x128] sm:$0xff]  ;;  %v1077_v54 = vld [vmem:[%s1391_s1 + $0x160] sm:$0xff] }
  0x11   :  { %568 = vmatpush.bf16.msra.mxu3 %v1061_v15  ;;  %v1087_v48 = vld [vmem:[%s1391_s1 + $0x1b0] sm:$0xff]  ;;  %v1078_v51 = vld [vmem:[%s1391_s1 + $0x168] sm:$0xff]  ;;  %v1085_v55 = vld [vmem:[%s1391_s1 + $0x1a0] sm:$0xff] }
  0x12   :  { %527 = vmatpush.bf16.msra.mxu0 %v1036_v16  ;;  %v1086_v52 = vld [vmem:[%s1391_s1 + $0x1a8] sm:$0xff]  ;;  %v1068_v56 = vld [vmem:[%s1391_s1 + $0x118] sm:$0xff]  ;;  %v1067_v59 = vld [vmem:[%s1391_s1 + $0x110] sm:$0xff] }
  0x13   :  { %541 = vmatpush.bf16.msra.mxu1 %v1044_v17  ;;  %v1076_v57 = vld [vmem:[%s1391_s1 + $0x158] sm:$0xff]  ;;  %v1075_v60 = vld [vmem:[%s1391_s1 + $0x150] sm:$0xff]  ;;  %v1066_v62 = vld [vmem:[%s1391_s1 + $0x108] sm:$0xff] }
  0x14   :  { %555 = vmatpush.bf16.msra.mxu2 %v1052_v18  ;;  %v1084_v58 = vld [vmem:[%s1391_s1 + $0x198] sm:$0xff]  ;;  %v1083_v61 = vld [vmem:[%s1391_s1 + $0x190] sm:$0xff]  ;;  %v1074_v63 = vld [vmem:[%s1391_s1 + $0x148] sm:$0xff] }
  0x15   :  { %569 = vmatpush.bf16.msra.mxu3 %v1060_v19  ;;  %v1082_v0 = vld [vmem:[%s1391_s1 + $0x188] sm:$0xff]  ;;  %v1065_v1 = vld [vmem:[%s1391_s1 + $0x100] sm:$0xff]  ;;  %v758_v4 = vld [vmem:[%s1393_s0 + $0x10] sm:$0xf] }
  0x16   :  { %528 = vmatpush.bf16.msra.mxu0 %v1035_v20  ;;  %v1073_v2 = vld [vmem:[%s1391_s1 + $0x140] sm:$0xff]  ;;  %v1031_v5 = vld [vmem:[%s1393_s0 + $0x28] sm:$0xf0]  ;;  %v1028_v6 = vld [vmem:[%s1393_s0 + $0x14] sm:$0xf] }
  0x17   :  { %542 = vmatpush.bf16.msra.mxu1 %v1043_v21  ;;  %v1081_v3 = vld [vmem:[%s1391_s1 + $0x180] sm:$0xff]  ;;  %v760_v7 = vld [vmem:[%s1393_s0 + $0x2c] sm:$0xf0]  ;;  %v766_v8 = vld [vmem:[%s1393_s0 + $0x18] sm:$0xf]  ;;  %v759_v10 = vor.u32 %v1031_v5, %v758_v4 }
  0x18   :  { %556 = vmatpush.bf16.msra.mxu2 %v1051_v22  ;;  %v1032_v9 = vld [vmem:[%s1393_s0 + $0x30] sm:$0xf0]  ;;  %v763_v11 = vor.u32 %v1028_v6, %v760_v7  ;;  %v1092_v13 = vld [vmem:[%s1395_s3 + $0x18] sm:$0xff]  ;;  %v1090_v15 = vld [vmem:[%s1395_s3 + $0x8] sm:$0xff] }
  0x19   :  { %570 = vmatpush.bf16.msra.mxu3 %v1059_v23  ;;  %v767_v12 = vor.u32 %v1032_v9, %v766_v8  ;;  %v1091_v14 = vld [vmem:[%s1395_s3 + $0x10] sm:$0xff]  ;;  %v1089_v18 = vld [vmem:[%s1395_s3] sm:$0xff]  ;;  %v1096_v21 = vld [vmem:[%s1396_s5 + $0x18] sm:$0xff] }
  0x1a   :  { %529 = vmatpush.bf16.msra.mxu0 %v1034_v24  ;;  %v1097_v20 = vld [vmem:[%s1392_s2] ss:$0 sm:$0xff] }
  0x1b   :  { %543 = vmatpush.bf16.msra.mxu1 %v1042_v25 }
  0x1c   :  { %557 = vmatpush.bf16.msra.mxu2 %v1050_v26 }
  0x1d   :  { %571 = vmatpush.bf16.msra.mxu3 %v1058_v28 }
  0x1e   :  { %530 = vmatpush.bf16.msra.mxu0 %v1033_v27 }
  0x1f   :  { %544 = vmatpush.bf16.msra.mxu1 %v1041_v29 }
  0x20   :  { %558 = vmatpush.bf16.msra.mxu2 %v1049_v30 }
  0x21   :  { %572 = vmatpush.bf16.msra.mxu3 %v1057_v40  ;;  %531 = vmatmul.bf16.vlgmr.msra.gmra.mxu0 %v743_v41 }
  0x22   :  { %579 = vmatpush.bf16.msrb.mxu0 %v1072_v31  ;;  %545 = vmatmul.bf16.vlgmr.msra.gmra.mxu1 %v747_v45 }
  0x23   :  { %593 = vmatpush.bf16.msrb.mxu1 %v1080_v38  ;;  %559 = vmatmul.bf16.vlgmr.msra.gmra.mxu2 %v751_v42 }
  0x24   :  { %607 = vmatpush.bf16.msrb.mxu2 %v1088_v39  ;;  %573 = vmatmul.bf16.vlgmr.msra.gmra.mxu3 %v755_v49 }
  0x25   :  { %668 = vmatpush.bf16.msrb.mxu3 %v1092_v13 }
  0x26   :  { %580 = vmatpush.bf16.msrb.mxu0 %v1071_v46 }
  0x27   :  { %594 = vmatpush.bf16.msrb.mxu1 %v1079_v47 }
  0x28   :  { %608 = vmatpush.bf16.msrb.mxu2 %v1087_v48 }
  0x29   :  { %669 = vmatpush.bf16.msrb.mxu3 %v1091_v14 }
  0x2a   :  { %581 = vmatpush.bf16.msrb.mxu0 %v1070_v50  ;;  %v1095_v50 = vld [vmem:[%s1396_s5 + $0x10] sm:$0xff] }
  0x2b   :  { %595 = vmatpush.bf16.msrb.mxu1 %v1078_v51  ;;  %v1094_v51 = vld [vmem:[%s1396_s5 + $0x8] sm:$0xff] }
  0x2c   :  { %609 = vmatpush.bf16.msrb.mxu2 %v1086_v52  ;;  %v1093_v52 = vld [vmem:[%s1396_s5] sm:$0xff] }
  0x2d   :  { %670 = vmatpush.bf16.msrb.mxu3 %v1090_v15 }
  0x2e   :  { %582 = vmatpush.bf16.msrb.mxu0 %v1069_v53 }
  0x2f   :  { %596 = vmatpush.bf16.msrb.mxu1 %v1077_v54  ;;  %v1098_v54 = vld [vmem:[%s1394_s4] ss:$0 sm:$0xff] }
  0x30   :  { %610 = vmatpush.bf16.msrb.mxu2 %v1085_v55 }
  0x31   :  { %671 = vmatpush.bf16.msrb.mxu3 %v1089_v18 }
  0x32   :  { %583 = vmatpush.bf16.msrb.mxu0 %v1068_v56 }
  0x33   :  { %597 = vmatpush.bf16.msrb.mxu1 %v1076_v57 }
  0x34   :  { %611 = vmatpush.bf16.msrb.mxu2 %v1084_v58 }
  0x35   :  { %724 = vmatpush.bf16.msra.mxu3 %v1096_v21 }
  0x36   :  { %584 = vmatpush.bf16.msrb.mxu0 %v1067_v59 }
  0x37   :  { %598 = vmatpush.bf16.msrb.mxu1 %v1075_v60 }
  0x38   :  { %612 = vmatpush.bf16.msrb.mxu2 %v1083_v61  ;;  %v1099_v61 = vld [vmem:[%s1397_s6] ss:$0 sm:$0xff] }
  0x39   :  { %725 = vmatpush.bf16.msra.mxu3 %v1095_v50 }
  0x3a   :  { %585 = vmatpush.bf16.msrb.mxu0 %v1066_v62 }
  0x3b   :  { %599 = vmatpush.bf16.msrb.mxu1 %v1074_v63 }
  0x3c   :  { %613 = vmatpush.bf16.msrb.mxu2 %v1082_v0 }
  0x3d   :  { %726 = vmatpush.bf16.msra.mxu3 %v1094_v51 }
  0x3e   :  { %586 = vmatpush.bf16.msrb.mxu0 %v1065_v1 }
  0x3f   :  { %600 = vmatpush.bf16.msrb.mxu1 %v1073_v2 }
  0x40   :  { %614 = vmatpush.bf16.msrb.mxu2 %v1081_v3 }
  0x41   :  { %587 = vmatmul.bf16.vlgmr.msrb.gmra.mxu0 %v759_v10  ;;  %727 = vmatpush.bf16.msra.mxu3 %v1093_v52 }
  0x42   :  { %601 = vmatmul.bf16.vlgmr.msrb.gmra.mxu1 %v763_v11 }
  0x43   :  { %615 = vmatmul.bf16.vlgmr.msrb.gmra.mxu2 %v767_v12 }
  0x9e   :  { %v532_v16 = vpop.f32.mrf.mxu0 }
  0x9f   :  { %v546_v17 = vpop.f32.mrf.mxu1  ;;  %v533_v23 = vadd.f32 %v1097_v20, %v532_v16 }
  0xa1   :  { %v547_v27 = vadd.f32 %v546_v17, %v533_v23 }
  0xa6   :  { %v560_v19 = vpop.f32.mrf.mxu2  ;;  %v534_v22 = vpop.f32.mrf.mxu0 }
  0xa7   :  { %v574_v24 = vpop.f32.mrf.mxu3  ;;  %v548_v25 = vpop.f32.mrf.mxu1  ;;  %v535_v26 = vadd.f32 %v1097_v20, %v534_v22  ;;  %v561_v31 = vadd.f32 %v560_v19, %v547_v27 }
  0xa9   :  { %v549_v29 = vadd.f32 %v548_v25, %v535_v26  ;;  %v575_v35 = vadd.f32 %v574_v24, %v561_v31 }
  0xae   :  { %v562_v28 = vpop.f32.mrf.mxu2 }
  0xaf   :  { %v563_v33 = vadd.f32 %v562_v28, %v549_v29  ;;  %v576_v34 = vpop.f32.mrf.mxu3 }
  0xb1   :  { %v577_v37 = vadd.f32 %v576_v34, %v563_v33 }
  0xbe   :  { %v588_v30 = vpop.f32.mrf.mxu0 }
  0xbf   :  { %v602_v32 = vpop.f32.mrf.mxu1  ;;  %v589_v38 = vadd.f32 %v588_v30, %v575_v35 }
  0xc1   :  { %v603_v41 = vadd.f32 %v602_v32, %v589_v38 }
  0xc6   :  { %v616_v36 = vpop.f32.mrf.mxu2  ;;  %v590_v39 = vpop.f32.mrf.mxu0 }
  0xc7   :  { %v591_v40 = vadd.f32 %v590_v39, %v577_v37  ;;  %v604_v42 = vpop.f32.mrf.mxu1  ;;  %v617_v43 = vadd.f32 %v616_v36, %v603_v41 }
  0xc9   :  { %v605_v44 = vadd.f32 %v604_v42, %v591_v40  ;;  %v621_v47 = vmax.f32 %v617_v43, 0.0 }
  0xce   :  { %v618_v45 = vpop.f32.mrf.mxu2 }
  0xcf   :  { %v619_v46 = vadd.f32 %v618_v45, %v605_v44 }
  0xd1   :  { %v622_v48 = vmax.f32 %v619_v46, 0.0 }
  0xd3   :  { %v623_v49 = vpack.c.bf16 %v622_v48, %v621_v47 }
  0xd5   :  { %1008 = vmatmul.msk.bf16.vlgmr.msrb.gmra.mxu3 %vm660_vm0, %v623_v49 }
 0x158   :  { %v673_v53 = vpop.f32.mrf.mxu3 }
 0x159   :  { %v674_v55 = vadd.f32 %v1098_v54, %v673_v53 }
 0x15b   :  { %v678_v58 = vmax.f32 %v674_v55, 0.0 }
 0x160   :  { %v675_v56 = vpop.f32.mrf.mxu3 }
 0x161   :  { %v676_v57 = vadd.f32 %v1098_v54, %v675_v56 }
 0x163   :  { %v679_v59 = vmax.f32 %v676_v57, 0.0 }
 0x165   :  { %v680_v60 = vpack.c.bf16 %v679_v59, %v678_v58 }
 0x167   :  { %1025 = vmatmul.msk.bf16.vlgmr.msra.gmra.mxu3 %vm660_vm0, %v680_v60 }
 0x1ea   :  { %v729_v62 = vpop.f32.mrf.mxu3 }
 0x1eb   :  { %v730_v63 = vadd.f32 %v1099_v61, %v729_v62 }
 0x1ed   :  { %734 = vst [vmem:[%s1398_s7] sm:$0xff] %v730_v63 }
 0x1f2   :  { %v731_v0 = vpop.f32.mrf.mxu3 }
 0x1f3   :  { %v732_v1 = vadd.f32 %v1099_v61, %v731_v0 }
 0x1f5   :  { %735 = vst [vmem:[%s1398_s7 + $0x8] sm:$0xff] %v732_v1 }

</bundles_post_ra>
